<compile_context>
chip_gen: v7x
topology: tpu7x:2x2x1
jax: 0.10.0
libtpu: 0.0.40
codegen_flags: <defaults>
</compile_context>

<pallas_src>
import jax
import jax.numpy as jnp
from jax import lax
from jax.experimental import pallas as pl
from jax.experimental.pallas import tpu as pltpu

EPS = 1e-5


def _cbn_kernel(xr_ref, xi_ref, prm_ref, or_ref, oi_ref):
    """BatchNorm both planes for one channel tile.

    Block shapes (VMEM):
      xr_ref / xi_ref / or_ref / oi_ref : (B, Cb, M) float32
      prm_ref                           : (Cb, 4)    float32
                                          cols = [gamma_r, beta_r, gamma_i, beta_i]
    Per-channel stats reduce over axes (0, 2).
    """
    nm = float(xr_ref.shape[0] * xr_ref.shape[2])        # static
    prm = prm_ref[...]                                    # (Cb, 4)

    def bn(x_ref, gamma, beta, o_ref):
        x = x_ref[...]                                    # (B, Cb, M)
        # per-channel mean: lane reduce then sublane/batch reduce
        s = jnp.sum(jnp.sum(x, axis=2, keepdims=True), axis=0, keepdims=True)
        mean = s / nm                                     # (1, Cb, 1)
        d = x - mean                                      # centered tile (reused below)
        ss = jnp.sum(jnp.sum(d * d, axis=2, keepdims=True),
                     axis=0, keepdims=True)
        var = ss / nm                                     # biased, two-pass (torch-faithful)
        scale = gamma * lax.rsqrt(var + EPS)              # (1, Cb, 1)
        o_ref[...] = d * scale + beta                     # == (x - mean) * scale + beta

    bn(xr_ref, prm[:, 0:1][None], prm[:, 1:2][None], or_ref)
    bn(xi_ref, prm[:, 2:3][None], prm[:, 3:4][None], oi_ref)


def _vmem_limit_bytes():
    """Generation-aware scoped-VMEM request: 3/4 of physical VMEM, capped at
    64 MiB (=> ~48 MiB on v7x's 64 MiB VMEM/TC, 64 MiB on v5e/v6e's 128 MiB)."""
    try:
        cap = int(pltpu.get_tpu_info().vmem_capacity_bytes)
    except Exception:
        cap = 64 * 1024 * 1024                 # conservative (v7x per-core) fallback
    return int(min(cap * 3 // 4, 64 * 1024 * 1024))


def _pick_channel_tile(B, C, M, vmem_limit):
    """Channel tile sized against ~2/3 of the requested VMEM limit assuming
    ~12 tile-sized buffers (2 in + 2 out planes double-buffered plus compiler
    temporaries), then capped so the parallel grid keeps >= 2 steps (>= 4 for
    larger C) so both v7x TensorCores get work."""
    per_ch = B * M * 4                          # bytes / channel / tile-sized buffer
    budget = (vmem_limit * 2) // 3
    n_bufs = 12
    cb_vmem = max(1, budget // (n_bufs * per_ch))
    if C >= 32:
        cb_grid = C // 4
    elif C >= 16:
        cb_grid = C // 2
    else:
        cb_grid = C
    cb = min(C, cb_vmem, cb_grid)
    if cb >= C:
        return C
    cb = max(8, (cb // 8) * 8)                  # partial blocks must be sublane-aligned
    # TODO(synk): if even cb=8 overflows the budget (huge B*M), a two-phase
    # stats/normalize reduction grid would be required.
    return min(cb, C)


def complex_batchnorm_naiv(x, gamma_r, beta_r, gamma_i, beta_i,
                           *, channel_tile=None):
    """x: complex64 (N, C, L). Returns complex64 (N, C, L)."""
    N, C, L = x.shape

    # complex64 -> two f32 planes (unavoidable boundary, see module TODO).
    xr = jnp.real(x).astype(jnp.float32)
    xi = jnp.imag(x).astype(jnp.float32)

    # Lane-dense presentation: keep the native (N, C, L) layout when L fills
    # whole vregs; otherwise fold batch into the lane dim -> (1, C, N*L) so
    # stores are unmasked (the transpose rides on the mandatory plane-
    # extraction copy above).
    fold = (L % 128) != 0
    if fold:
        xr = xr.transpose(1, 0, 2).reshape(1, C, N * L)
        xi = xi.transpose(1, 0, 2).reshape(1, C, N * L)
    B, M = xr.shape[0], xr.shape[2]

    # pack the four per-channel affine vectors into one (C, 4) array
    prm = jnp.stack([gamma_r.astype(jnp.float32), beta_r.astype(jnp.float32),
                     gamma_i.astype(jnp.float32), beta_i.astype(jnp.float32)],
                    axis=1)

    vmem_limit = _vmem_limit_bytes()

    cb = (_pick_channel_tile(B, C, M, vmem_limit)
          if channel_tile is None else int(channel_tile))
    if cb >= C:
        cb = C                       # full-C block (allowed for any C)
    elif cb % 8 != 0:
        cb = max(8, (cb // 8) * 8)   # partial blocks must be multiples of 8
        cb = min(cb, C)

    grid = (pl.cdiv(C, cb),)
    data_spec = pl.BlockSpec((B, cb, M), lambda c: (0, c, 0))
    prm_spec = pl.BlockSpec((cb, 4), lambda c: (c, 0))

    out_r, out_i = pl.pallas_call(
        _cbn_kernel,
        out_shape=(
            jax.ShapeDtypeStruct((B, C, M), jnp.float32),
            jax.ShapeDtypeStruct((B, C, M), jnp.float32),
        ),
        grid=grid,
        in_specs=[data_spec, data_spec, prm_spec],
        out_specs=(data_spec, data_spec),
        compiler_params=pltpu.CompilerParams(
            dimension_semantics=("parallel",),
            vmem_limit_bytes=vmem_limit,
        ),
    )(xr, xi, prm)

    if fold:
        out_r = out_r.reshape(C, N, L).transpose(1, 0, 2)
        out_i = out_i.reshape(C, N, L).transpose(1, 0, 2)

    # Pallas has no complex dtype; repack the planes with a single XLA op.
    return lax.complex(out_r, out_i)


def _reference(x, gamma_r, beta_r, gamma_i, beta_i):
    """Pure-JAX reference matching torch BatchNorm1d training forward."""
    def bn(p, g, b):
        mean = jnp.mean(p, axis=(0, 2), keepdims=True)
        var = jnp.mean((p - mean) ** 2, axis=(0, 2), keepdims=True)
        xhat = (p - mean) / jnp.sqrt(var + EPS)
        return xhat * g[None, :, None] + b[None, :, None]
    return lax.complex(bn(jnp.real(x), gamma_r, beta_r),
                       bn(jnp.imag(x), gamma_i, beta_i))


def _make_case(key, N, C, L):
    ks = jax.random.split(key, 6)
    xr = jax.random.normal(ks[0], (N, C, L), dtype=jnp.float32)
    xi = jax.random.normal(ks[1], (N, C, L), dtype=jnp.float32)
    x = lax.complex(xr, xi)
    gamma_r = 1.0 + 0.1 * jax.random.normal(ks[2], (C,), dtype=jnp.float32)
    beta_r = 0.1 * jax.random.normal(ks[3], (C,), dtype=jnp.float32)
    gamma_i = 1.0 + 0.1 * jax.random.normal(ks[4], (C,), dtype=jnp.float32)
    beta_i = 0.1 * jax.random.normal(ks[5], (C,), dtype=jnp.float32)
    return x, gamma_r, beta_r, gamma_i, beta_i


def _check(out, ref, shape):
    assert out.shape == shape and out.dtype == jnp.complex64
    assert jnp.allclose(out.real, ref.real, atol=1e-5, rtol=1e-5)
    assert jnp.allclose(out.imag, ref.imag, atol=1e-5, rtol=1e-5)


if __name__ == "__main__":
    key = jax.random.PRNGKey(0)
    k_a, k_b, k_c = jax.random.split(key, 3)

    # Case 1: lane-dense native layout (L multiple of 128), forced channel tile
    # of 8 so the multi-step channel grid (grid=(2,)) is exercised.
    N, C, L = 4, 16, 128
    x, gr, br, gi, bi = _make_case(k_a, N, C, L)
    out = complex_batchnorm_naiv(x, gr, br, gi, bi, channel_tile=8)
    out = jax.block_until_ready(out)
    _check(out, _reference(x, gr, br, gi, bi), (N, C, L))

    # Case 2: small L (not a multiple of 128) -> folded (1, C, N*L) lane-dense
    # presentation, single full-C block.
    N2, C2, L2 = 8, 4, 16
    x2, gr2, br2, gi2, bi2 = _make_case(k_b, N2, C2, L2)
    out2 = complex_batchnorm_naiv(x2, gr2, br2, gi2, bi2)
    out2 = jax.block_until_ready(out2)
    _check(out2, _reference(x2, gr2, br2, gi2, bi2), (N2, C2, L2))

    # Case 3: auto tiling with C >= 32 -> grid capped to >= 4 parallel steps.
    N3, C3, L3 = 2, 32, 256
    x3, gr3, br3, gi3, bi3 = _make_case(k_c, N3, C3, L3)
    out3 = complex_batchnorm_naiv(x3, gr3, br3, gi3, bi3)
    out3 = jax.block_until_ready(out3)
    _check(out3, _reference(x3, gr3, br3, gi3, bi3), (N3, C3, L3))

    print("KERNEL_OK")
</pallas_src>

<mosaic_0001>
module attributes {stable_mosaic.version = 11 : i64} {
  func.func @_cbn_kernel(%arg0: i32, %arg1: memref<4x8x128xf32, #tpu.memory_space<vmem>>, %arg2: memref<4x8x128xf32, #tpu.memory_space<vmem>>, %arg3: memref<8x4xf32, #tpu.memory_space<vmem>>, %arg4: memref<4x8x128xf32, #tpu.memory_space<vmem>>, %arg5: memref<4x8x128xf32, #tpu.memory_space<vmem>>) attributes {dimension_semantics = [#tpu.dimension_semantics<parallel>], iteration_bounds = array<i64: 2>, scalar_prefetch = 0 : i64, scratch_operands = 0 : i64, tpu.core_type = #tpu.core_type<tc>, window_params = [{transform_indices = @transform_0, window_bounds = array<i64: 4, 8, 128>}, {transform_indices = @transform_1, window_bounds = array<i64: 4, 8, 128>}, {transform_indices = @transform_2, window_bounds = array<i64: 8, 4>}, {transform_indices = @transform_3, window_bounds = array<i64: 4, 8, 128>}, {transform_indices = @transform_4, window_bounds = array<i64: 4, 8, 128>}]} {
    %c0 = arith.constant 0 : index
    %c0_0 = arith.constant 0 : index
    %0 = vector.load %arg3[%c0, %c0_0] : memref<8x4xf32, #tpu.memory_space<vmem>>, vector<8x4xf32>
    %1 = vector.extract_strided_slice %0 {offsets = [0, 0], sizes = [8, 1], strides = [1, 1]} : vector<8x4xf32> to vector<8x1xf32>
    %2 = vector.shape_cast %1 : vector<8x1xf32> to vector<1x8x1xf32>
    %3 = vector.extract_strided_slice %0 {offsets = [0, 1], sizes = [8, 1], strides = [1, 1]} : vector<8x4xf32> to vector<8x1xf32>
    %4 = vector.shape_cast %3 : vector<8x1xf32> to vector<1x8x1xf32>
    %c0_1 = arith.constant 0 : index
    %c0_2 = arith.constant 0 : index
    %c0_3 = arith.constant 0 : index
    %5 = vector.load %arg1[%c0_1, %c0_2, %c0_3] : memref<4x8x128xf32, #tpu.memory_space<vmem>>, vector<4x8x128xf32>
    %cst = arith.constant dense<0.000000e+00> : vector<4x8xf32>
    %6 = vector.multi_reduction <add>, %5, %cst [2] : vector<4x8x128xf32> to vector<4x8xf32>
    %7 = vector.shape_cast %6 : vector<4x8xf32> to vector<4x8x1xf32>
    %cst_4 = arith.constant dense<0.000000e+00> : vector<8x1xf32>
    %8 = vector.multi_reduction <add>, %7, %cst_4 [0] : vector<4x8x1xf32> to vector<8x1xf32>
    %9 = vector.shape_cast %8 : vector<8x1xf32> to vector<1x8x1xf32>
    %cst_5 = arith.constant 5.120000e+02 : f32
    %10 = vector.broadcast %cst_5 : f32 to vector<1x8x1xf32>
    %11 = arith.divf %9, %10 : vector<1x8x1xf32>
    %12 = vector.broadcast %11 : vector<1x8x1xf32> to vector<4x8x128xf32>
    %13 = arith.subf %5, %12 : vector<4x8x128xf32>
    %14 = arith.mulf %13, %13 : vector<4x8x128xf32>
    %cst_6 = arith.constant dense<0.000000e+00> : vector<4x8xf32>
    %15 = vector.multi_reduction <add>, %14, %cst_6 [2] : vector<4x8x128xf32> to vector<4x8xf32>
    %16 = vector.shape_cast %15 : vector<4x8xf32> to vector<4x8x1xf32>
    %cst_7 = arith.constant dense<0.000000e+00> : vector<8x1xf32>
    %17 = vector.multi_reduction <add>, %16, %cst_7 [0] : vector<4x8x1xf32> to vector<8x1xf32>
    %18 = vector.shape_cast %17 : vector<8x1xf32> to vector<1x8x1xf32>
    %cst_8 = arith.constant 5.120000e+02 : f32
    %19 = vector.broadcast %cst_8 : f32 to vector<1x8x1xf32>
    %20 = arith.divf %18, %19 : vector<1x8x1xf32>
    %cst_9 = arith.constant 9.99999974E-6 : f32
    %21 = vector.broadcast %cst_9 : f32 to vector<1x8x1xf32>
    %22 = arith.addf %20, %21 : vector<1x8x1xf32>
    %23 = math.rsqrt %22 : vector<1x8x1xf32>
    %24 = arith.mulf %2, %23 : vector<1x8x1xf32>
    %25 = vector.broadcast %24 : vector<1x8x1xf32> to vector<4x8x128xf32>
    %26 = arith.mulf %13, %25 : vector<4x8x128xf32>
    %27 = vector.broadcast %4 : vector<1x8x1xf32> to vector<4x8x128xf32>
    %28 = arith.addf %26, %27 : vector<4x8x128xf32>
    %c0_10 = arith.constant 0 : index
    %c0_11 = arith.constant 0 : index
    %c0_12 = arith.constant 0 : index
    %29 = vector.load %arg4[%c0_10, %c0_11, %c0_12] : memref<4x8x128xf32, #tpu.memory_space<vmem>>, vector<4x8x128xf32>
    tpu.vector_store %arg4[%c0_10, %c0_11, %c0_12], %28 {strides = array<i32>} : memref<4x8x128xf32, #tpu.memory_space<vmem>>, vector<4x8x128xf32>,
    %30 = vector.extract_strided_slice %0 {offsets = [0, 2], sizes = [8, 1], strides = [1, 1]} : vector<8x4xf32> to vector<8x1xf32>
    %31 = vector.shape_cast %30 : vector<8x1xf32> to vector<1x8x1xf32>
    %32 = vector.extract_strided_slice %0 {offsets = [0, 3], sizes = [8, 1], strides = [1, 1]} : vector<8x4xf32> to vector<8x1xf32>
    %33 = vector.shape_cast %32 : vector<8x1xf32> to vector<1x8x1xf32>
    %c0_13 = arith.constant 0 : index
    %c0_14 = arith.constant 0 : index
    %c0_15 = arith.constant 0 : index
    %34 = vector.load %arg2[%c0_13, %c0_14, %c0_15] : memref<4x8x128xf32, #tpu.memory_space<vmem>>, vector<4x8x128xf32>
    %cst_16 = arith.constant dense<0.000000e+00> : vector<4x8xf32>
    %35 = vector.multi_reduction <add>, %34, %cst_16 [2] : vector<4x8x128xf32> to vector<4x8xf32>
    %36 = vector.shape_cast %35 : vector<4x8xf32> to vector<4x8x1xf32>
    %cst_17 = arith.constant dense<0.000000e+00> : vector<8x1xf32>
    %37 = vector.multi_reduction <add>, %36, %cst_17 [0] : vector<4x8x1xf32> to vector<8x1xf32>
    %38 = vector.shape_cast %37 : vector<8x1xf32> to vector<1x8x1xf32>
    %cst_18 = arith.constant 5.120000e+02 : f32
    %39 = vector.broadcast %cst_18 : f32 to vector<1x8x1xf32>
    %40 = arith.divf %38, %39 : vector<1x8x1xf32>
    %41 = vector.broadcast %40 : vector<1x8x1xf32> to vector<4x8x128xf32>
    %42 = arith.subf %34, %41 : vector<4x8x128xf32>
    %43 = arith.mulf %42, %42 : vector<4x8x128xf32>
    %cst_19 = arith.constant dense<0.000000e+00> : vector<4x8xf32>
    %44 = vector.multi_reduction <add>, %43, %cst_19 [2] : vector<4x8x128xf32> to vector<4x8xf32>
    %45 = vector.shape_cast %44 : vector<4x8xf32> to vector<4x8x1xf32>
    %cst_20 = arith.constant dense<0.000000e+00> : vector<8x1xf32>
    %46 = vector.multi_reduction <add>, %45, %cst_20 [0] : vector<4x8x1xf32> to vector<8x1xf32>
    %47 = vector.shape_cast %46 : vector<8x1xf32> to vector<1x8x1xf32>
    %cst_21 = arith.constant 5.120000e+02 : f32
    %48 = vector.broadcast %cst_21 : f32 to vector<1x8x1xf32>
    %49 = arith.divf %47, %48 : vector<1x8x1xf32>
    %cst_22 = arith.constant 9.99999974E-6 : f32
    %50 = vector.broadcast %cst_22 : f32 to vector<1x8x1xf32>
    %51 = arith.addf %49, %50 : vector<1x8x1xf32>
    %52 = math.rsqrt %51 : vector<1x8x1xf32>
    %53 = arith.mulf %31, %52 : vector<1x8x1xf32>
    %54 = vector.broadcast %53 : vector<1x8x1xf32> to vector<4x8x128xf32>
    %55 = arith.mulf %42, %54 : vector<4x8x128xf32>
    %56 = vector.broadcast %33 : vector<1x8x1xf32> to vector<4x8x128xf32>
    %57 = arith.addf %55, %56 : vector<4x8x128xf32>
    %c0_23 = arith.constant 0 : index
    %c0_24 = arith.constant 0 : index
    %c0_25 = arith.constant 0 : index
    %58 = vector.load %arg5[%c0_23, %c0_24, %c0_25] : memref<4x8x128xf32, #tpu.memory_space<vmem>>, vector<4x8x128xf32>
    tpu.vector_store %arg5[%c0_23, %c0_24, %c0_25], %57 {strides = array<i32>} : memref<4x8x128xf32, #tpu.memory_space<vmem>>, vector<4x8x128xf32>,
    return
  }
  func.func @transform_0(%arg0: i32) -> (i32, i32, i32) {
    %c0_i32 = arith.constant 0 : i32
    %c0_i32_0 = arith.constant 0 : i32
    %c0_i32_1 = arith.constant 0 : i32
    return %c0_i32, %arg0, %c0_i32_0 : i32, i32, i32
  }
  func.func @transform_1(%arg0: i32) -> (i32, i32, i32) {
    %c0_i32 = arith.constant 0 : i32
    %c0_i32_0 = arith.constant 0 : i32
    %c0_i32_1 = arith.constant 0 : i32
    return %c0_i32, %arg0, %c0_i32_0 : i32, i32, i32
  }
  func.func @transform_2(%arg0: i32) -> (i32, i32) {
    %c0_i32 = arith.constant 0 : i32
    %c0_i32_0 = arith.constant 0 : i32
    return %arg0, %c0_i32 : i32, i32
  }
  func.func @transform_3(%arg0: i32) -> (i32, i32, i32) {
    %c0_i32 = arith.constant 0 : i32
    %c0_i32_0 = arith.constant 0 : i32
    %c0_i32_1 = arith.constant 0 : i32
    return %c0_i32, %arg0, %c0_i32_0 : i32, i32, i32
  }
  func.func @transform_4(%arg0: i32) -> (i32, i32, i32) {
    %c0_i32 = arith.constant 0 : i32
    %c0_i32_0 = arith.constant 0 : i32
    %c0_i32_1 = arith.constant 0 : i32
    return %c0_i32, %arg0, %c0_i32_0 : i32, i32, i32
  }
}

</mosaic_0001>

<bundles_post_ra>
// kernel: tpu_custom_call.1
= control target key start
LH: loop header
LB: loop body
LE: loop exit
PB: predicated region body
PF: predicated region fallthrough
CT: control target
= control target key end

     0   :  { %10 = vsyncpa [#allocation3], 0  ;;  %s1190_s0 = inlined_call_operand.hbm [shape: f32[4,16,128], index: 0, kind: input, shape index: {}]   ;;  %s1191_s1 = inlined_call_operand.hbm [shape: f32[4,16,128], index: 1, kind: input, shape index: {}]   ;;  %s1192_s2 = inlined_call_operand.vmem [shape: f32[16,4], index: 2, kind: input, shape index: {}]   ;;  %s1193_s3 = inlined_call_operand.hbm [shape: f32[4,16,128], index: 3, kind: output, shape index: {0}]   ;;  %s1194_s4 = inlined_call_operand.hbm [shape: f32[4,16,128], index: 4, kind: output, shape index: {1}]  }
   0x1   :  { %12 = vsyncpa [#allocation3 + $0x1], 0 }
   0x2   :  { %13 = vsyncpa [#allocation6], 0 }
   0x3   :  { %15 = vsyncpa [#allocation6 + $0x1], 0 }
   0x4   :  { %16 = vsyncpa [#allocation4], 0 }
   0x5   :  { %18 = vsyncpa [#allocation4 + $0x1], 0 }
   0x6   :  { %19 = vsyncpa [#allocation9], 0 }
   0x7   :  { %21 = vsyncpa [#allocation9 + $0x1], 0  ;;  %s875_s15 = smov 0   ;;  %s877_s16 = smov 0  }
   0x8   :  { %s879_s17 = smov 0   ;;  %s881_s18 = smov 0  }
   0x9 LB: > { %s896_s19 = sadd.s32 4294967295, %s834_s18   ;;  %s578_s20 = sadd.s32 4294967294, %s834_s18   ;;  %s834_s18 = sphi %s881_s18, %s1213_s18   ;;  %s830_s17 = sphi %s879_s17, %s1212_s17   ;;  %s826_s16 = sphi %s877_s16, %s1211_s16   ;;  %s822_s15 = sphi %s875_s15, %s1210_s15  }
   0xa   : > { %s900_s21 = sadd.s32 1, %s834_s18   ;;  %s34_s22 = sadd.s32 1, %s830_s17 }
   0xb   : > { %s31_s23 = ssub.s32 %s834_s18, %s900_s21  ;;  %p41_p0 = scmp.ne.s32.totalorder %s830_s17, %s826_s16 }
   0xc   : > { %p32_p1 = scmp.eq.s32.totalorder %s31_s23, 0  ;;  %p42_p2 = scmp.eq.s32.totalorder %s834_s18, 0 }
   0xd   : > { %p47_p3 = scmp.ne.s32.totalorder %s826_s16, %s822_s15  ;;  %p48_p4 = scmp.eq.s32.totalorder %s896_s19, 0 }
   0xe   : > { %s912_s24 = scalar_select %p32_p1, %s830_s17, %s34_s22  }
   0xf   : > { %p914_p5 = por %p42_p2, %p41_p0  ;;  %p918_p6 = por %p48_p4, %p47_p3 }
  0x10   : > { %p123_p7 = scmp.eq.s32.totalorder %s896_s19, 1  ;;  %p129_p8 = scmp.eq.s32.totalorder %s578_s20, 1 }
  0x11   : > { %s1199_s26 = scalar_select %p918_p6, 1, 0 }
  0x12   : > { %p619_p10 = scmp.lt.s32.totalorder %s834_s18, 2  ;;  %p925_p11 = por %p123_p7, %p41_p0 }
  0x13   : > { %p929_p12 = por %p129_p8, %p47_p3  ;;  %s934_s29 = sand.u32 1, %s830_s17  }
  0x14   : > { %s1200_s27 = scalar_select %p925_p11, 1, 0 }
  0x15   : > { %s1201_s28 = scalar_select %p929_p12, 1, 0 }
  0x16   : > { %s582_s30 = sshll.u32 %s834_s18, 7  ;;  %s581_s5 = sshll.u32 %s934_s29, 5 }
  0x17   : > { %s943_s8 = scalar_lea.hbm %s1190_s0, %s582_s30  ;;  %s179_s9 = scalar_lea.vmem [#allocation2], %s581_s5 }
  0x18   : > { %s185_s10 = sshll.u32 %s179_s9, 4  ;;  %p949_p13 = pnand %p619_p10, %p914_p5  ;;  %s953_s10 = int_to_ptr.vmem [resolvable:$true] %s185_s10 }
  0x19   : > { %s176_s12 = scalar_lea.sflag [#allocation3], %s934_s29  ;;  %s672_s13 = scalar_lea.hbm %s943_s8, 512 }
  0x1a   : > { %p673_p1 = scmp.ne.s32.totalorder %s943_s8, %s672_s13  ;;  %p674_p2 = pneg %p949_p13 }
  0x1b   : > { %s677_s22 = scalar_lea.hbm %s1190_s0, 1024  ;;  %p678_p5 = scmp.lt.u32.totalorder %s943_s8, %s1190_s0 }
  0x1c   : > { %p675_p3 = pnand %p674_p2, %p673_p1  ;;  %p679_p7 = scmp.lt.u32.totalorder %s677_s22, %s672_s13 }
  0x1d   : > { %p681_p10 = scmp.lt.u32.totalorder %s672_s13, %s943_s8 }
  0x1e   : > { %p676_p4 = pneg %p675_p3  ;;  %p680_p8 = por %p679_p7, %p678_p5 }
  0x20   : > { %p682_p9 = por %p681_p10, %p680_p8 }
  0x22   : > { %p683_p0 = pnand %p682_p9, %p676_p4 }
  0x24   : > { %686 = shalt.err (!%p683_p0)
}
  0x25   : > { %s687_s6 = scalar_lea.vmem %s953_s10, 512  ;;  %s836_s7 = smov [#allocation2]  }
  0x26   : > { %p688_p1 = scmp.ne.s32.totalorder %s953_s10, %s687_s6  ;;  %s692_s9 = sshll.u32 %s836_s7, 4  ;;  %s693_s9 = int_to_ptr.vmem [resolvable:$false] %s692_s9 }
  0x27   : > { %s694_s14 = scalar_lea.vmem %s693_s9, 1024  ;;  %p695_p11 = scmp.lt.s32.totalorder %s953_s10, %s693_s9 }
  0x28   : > { %p690_p3 = pnand %p688_p1, %p674_p2  ;;  %p696_p5 = scmp.lt.s32.totalorder %s694_s14, %s687_s6 }
  0x2a   : > { %p691_p12 = pneg %p690_p3  ;;  %p697_p7 = por %p696_p5, %p695_p11 }
  0x2c   : > { %p698_p8 = pnand %p697_p7, %p691_p12 }
  0x2e   : > { %701 = shalt.err (!%p698_p8)
}
  0x2f   : > { %s1196_s13 = smov 256   ;;  %s838_s20 = smov 128  }
  0x30   : > { %s839_s22 = smov 8   ;;  %p220_p9 = scmp.lt.s32.totalorder %s834_s18, 3 }
  0x31   : > { %608 = dma.hbm_to_vmem [thread:$0]  (!%p949_p13), %s943_s8, 512, %s953_s10, %s176_s12, %s1196_s13, %s838_s20, %s839_s22  }
  0x32   : > { %s993_s6 = scalar_lea.hbm %s1191_s1, %s582_s30  ;;  %p1203_p11 = scmp.ge.s32.totalorder %s834_s18, 1 }
  0x33   : > { %s199_s9 = scalar_lea.vmem [#allocation5], %s581_s5  ;;  %s196_s8 = scalar_lea.sflag [#allocation6], %s934_s29 }
  0x34   : > { %p997_p12 = pnand %p1203_p11, %p220_p9  ;;  %s205_s14 = sshll.u32 %s199_s9, 4  ;;  %s1003_s14 = int_to_ptr.vmem [resolvable:$true] %s205_s14 }
  0x35   : > { %s702_s10 = scalar_lea.hbm %s993_s6, 512  ;;  %s707_s23 = scalar_lea.hbm %s1191_s1, 1024 }
  0x36   : > { %p703_p0 = scmp.ne.s32.totalorder %s993_s6, %s702_s10  ;;  %p708_p1 = scmp.lt.u32.totalorder %s993_s6, %s1191_s1 }
  0x37   : > { %p709_p3 = scmp.lt.u32.totalorder %s707_s23, %s702_s10  ;;  %p711_p7 = scmp.lt.u32.totalorder %s702_s10, %s993_s6 }
  0x38   : > { %p705_p4 = pnand %p703_p0, %p674_p2 }
  0x39   : > { %p710_p5 = por %p709_p3, %p708_p1 }
  0x3a   : > { %p706_p10 = pneg %p705_p4 }
  0x3b   : > { %p712_p8 = por %p711_p7, %p710_p5 }
  0x3d   : > { %p713_p9 = pnand %p712_p8, %p706_p10 }
  0x3f   : > { %716 = shalt.err (!%p713_p9)
}
  0x40   : > { %s717_s5 = scalar_lea.vmem %s1003_s14, 512  ;;  %s840_s9 = smov [#allocation5]  }
  0x41   : > { %p718_p11 = scmp.ne.s32.totalorder %s1003_s14, %s717_s5  ;;  %s722_s30 = sshll.u32 %s840_s9, 4  ;;  %s723_s30 = int_to_ptr.vmem [resolvable:$false] %s722_s30 }
  0x42   : > { %s724_s13 = scalar_lea.vmem %s723_s30, 1024  ;;  %p725_p6 = scmp.lt.s32.totalorder %s1003_s14, %s723_s30 }
  0x43   : > { %p720_p0 = pnand %p718_p11, %p674_p2  ;;  %p726_p1 = scmp.lt.s32.totalorder %s724_s13, %s717_s5 }
  0x45   : > { %p721_p4 = pneg %p720_p0  ;;  %p727_p3 = por %p726_p1, %p725_p6 }
  0x47   : > { %p728_p5 = pnand %p727_p3, %p721_p4 }
  0x49   : > { %731 = shalt.err (!%p728_p5)
}
  0x4a   : > { %s1205_s10 = smov 256   ;;  %224 = sbr.rel (%p997_p12) target bundleno = 593 (0x251), region = 32 }
  0x4b   : > { %611 = dma.hbm_to_vmem [thread:$0]  (!%p949_p13), %s993_s6, 512, %s1003_s14, %s196_s8, %s1205_s10, %s838_s20, %s839_s22  }
  0x4c   : > { %s1037_s12 = sand.u32 (!%p997_p12), 1, %s826_s16   ;;  %p1206_p6 = scmp.ne.s32.totalorder (!%p997_p12), %s1199_s26, 0 }
  0x4d   : > { %s1040_s23 = sshll.u32 (!%p997_p12), %s1037_s12, 5  ;;  %s227_s11 = scalar_lea.sflag (!%p997_p12), [#allocation3], %s1037_s12 }
  0x4e   : > { %s230_s25 = scalar_lea.vmem (!%p997_p12), [#allocation2], %s1040_s23 }
  0x51   : > { %805 = dma.done.wait (%p1206_p6), %s227_s11, 512  }
  0x52   : > { %807 = vsyncadd (%p1206_p6), %s227_s11, 4294966784  ;;  %s236_s29 = scalar_lea.sflag [#allocation6], %s1037_s12  ;;  %s239_s20 = scalar_lea.vmem [#allocation5], %s1040_s23 }
  0x53   : > { %809 = dma.done.wait (%p1206_p6), %s236_s29, 512  }
  0x54   : > { %811 = vsyncadd (%p1206_p6), %s236_s29, 4294966784  ;;  %v345_v0 = vld [vmem:[%s239_s20] sm:$0xff]  ;;  %v346_v2 = vld [vmem:[%s239_s20 + $0x8] sm:$0xff]  ;;  %p278_p13 = scmp.lt.s32.totalorder %s896_s19, 1  ;;  %v841_v40 = vmov 1   ;;  %v842_v41 = vmov 0  }
  0x55   : > { %v283_v1 = vld [vmem:[%s230_s25] sm:$0xff]  ;;  %349 = vadd.xlane.f32.xlu1 %v345_v0  ;;  %v284_v3 = vld [vmem:[%s230_s25 + $0x8] sm:$0xff]  ;;  %v347_v4 = vld [vmem:[%s239_s20 + $0x10] sm:$0xff]  ;;  %663 = vset.pattern.permute.xlu0 %v842_v41  ;;  %v843_v43 = vmov 2   ;;  %s270_s8 = scalar_lea.vmem [#allocation7], %s1040_s23  ;;  %s593_s9 = sshll.u32 %s896_s19, 7 }
  0x56   : > { %287 = vadd.xlane.f32.xlu0 %v283_v1  ;;  %v285_v5 = vld [vmem:[%s230_s25 + $0x10] sm:$0xff]  ;;  %v348_v6 = vld [vmem:[%s239_s20 + $0x18] sm:$0xff]  ;;  %664 = vset.pattern.permute.xlu1 %v841_v40  ;;  %s279_s26 = scalar_select %p278_p13, %s896_s19, 1 }
  0x57   : > { %v286_v7 = vld [vmem:[%s230_s25 + $0x18] sm:$0xff]  ;;  %s423_s5 = sshll.u32 %s270_s8, 4  ;;  %s1095_s30 = scalar_lea.vmem [#allocation8], %s1040_s23  ;;  %s1088_s5 = int_to_ptr.vmem [resolvable:$true] %s423_s5 }
  0x58   : > { %s590_s22 = sshll.u32 %s279_s26, 3  ;;  %s438_s13 = sshll.u32 %s1095_s30, 4  ;;  %s1107_s13 = int_to_ptr.vmem [resolvable:$true] %s438_s13 }
  0x59   : > { %351 = vadd.xlane.f32.xlu1 %v346_v2  ;;  %s281_s14 = scalar_lea.vmem %s1192_s2, %s590_s22  ;;  %s1105_s23 = scalar_lea.hbm %s1193_s3, %s593_s9 }
  0x5a   : > { %289 = vadd.xlane.f32.xlu0 %v284_v3  ;;  %v282_v42 = vld [vmem:[%s281_s14] sm:$0xff]  ;;  %s1112_s29 = scalar_lea.hbm %s1194_s4, %s593_s9  ;;  %s406_s20 = scalar_lea.sflag [#allocation4], %s1037_s12 }
  0x5b   : > { %s732_s26 = scalar_lea.vmem %s1088_s5, 512  ;;  %p1207_p12 = scmp.ne.s32.totalorder %s1200_s27, 0 }
  0x5c   : > { %p733_p2 = scmp.ne.s32.totalorder %s1088_s5, %s732_s26  ;;  %s845_s22 = smov [#allocation7]  }
  0x5d   : > { %353 = vadd.xlane.f32.xlu1 %v347_v4  ;;  %s736_s6 = sshll.u32 %s845_s22, 4  ;;  %s737_s6 = int_to_ptr.vmem [resolvable:$false] %s736_s6 }
  0x5e   : > { %291 = vadd.xlane.f32.xlu0 %v285_v5  ;;  %p734_p10 = pnand %p733_p2, %p1207_p12  ;;  %s738_s7 = scalar_lea.vmem %s737_s6, 1024 }
  0x5f   : > { %p739_p8 = scmp.lt.s32.totalorder %s1088_s5, %s737_s6  ;;  %p740_p9 = scmp.lt.s32.totalorder %s738_s7, %s732_s26 }
  0x60   : > { %p735_p7 = pneg %p734_p10 }
  0x61   : > { %355 = vadd.xlane.f32.xlu1 %v348_v6  ;;  %p741_p11 = por %p740_p9, %p739_p8 }
  0x62   : > { %293 = vadd.xlane.f32.xlu0 %v286_v7 }
  0x63   : > { %p742_p0 = pnand %p741_p11, %p735_p7 }
  0xe2   : > { %v350_v8 = vpop.xlane.xlu1 %349 }
  0xe3   : > { %v288_v9 = vpop.xlane.xlu0 %287 }
  0xe6   : > { %v352_v10 = vpop.xlane.xlu1 %351 }
  0xe7   : > { %v290_v11 = vpop.xlane.xlu0 %289  ;;  %v357_v14 = vadd.f32 %v352_v10, %v350_v8 }
  0xe8   : > { %v295_v15 = vadd.f32 %v290_v11, %v288_v9 }
  0xea   : > { %v354_v12 = vpop.xlane.xlu1 %353 }
  0xeb   : > { %v292_v13 = vpop.xlane.xlu0 %291  ;;  %v358_v16 = vadd.f32 %v357_v14, %v354_v12 }
  0xec   : > { %v296_v17 = vadd.f32 %v295_v15, %v292_v13 }
  0xee   : > { %v356_v18 = vpop.xlane.xlu1 %355 }
  0xef   : > { %v294_v19 = vpop.xlane.xlu0 %293  ;;  %v359_v20 = vadd.f32 %v358_v16, %v356_v18 }
  0xf0   : > { %v297_v21 = vadd.f32 %v296_v17, %v294_v19 }
  0xf1   : > { %v360_v22 = vmul.f32 0.001953125, %v359_v20 }
  0xf2   : > { %v299_v23 = vmul.f32 0.001953125, %v297_v21 }
  0xf3   : > { %v1062_v28 = vsub.f32 %v346_v2, %v360_v22  ;;  %v1064_v29 = vsub.f32 %v345_v0, %v360_v22  ;;  %v1070_v32 = vsub.f32 %v347_v4, %v360_v22  ;;  %v1078_v36 = vsub.f32 %v348_v6, %v360_v22 }
  0xf4   : > { %v1054_v24 = vsub.f32 %v284_v3, %v299_v23  ;;  %v1056_v25 = vsub.f32 %v283_v1, %v299_v23  ;;  %v1072_v33 = vsub.f32 %v285_v5, %v299_v23  ;;  %v303_v37 = vsub.f32 %v286_v7, %v299_v23 }
  0xf5   : > { %v366_v30 = vmul.f32 %v1062_v28, %v1062_v28  ;;  %v365_v31 = vmul.f32 %v1064_v29, %v1064_v29  ;;  %v367_v34 = vmul.f32 %v1070_v32, %v1070_v32  ;;  %v368_v38 = vmul.f32 %v1078_v36, %v1078_v36 }
  0xf6   : > { %v305_v26 = vmul.f32 %v1054_v24, %v1054_v24  ;;  %v304_v27 = vmul.f32 %v1056_v25, %v1056_v25  ;;  %v306_v35 = vmul.f32 %v1072_v33, %v1072_v33  ;;  %v307_v39 = vmul.f32 %v303_v37, %v303_v37 }
  0xf7   : > { %v844_v2 = vmov 3  }
  0xf8   : > { %310 = vadd.xlane.f32.xlu1 %v305_v26  ;;  %308 = vadd.xlane.f32.xlu0 %v304_v27 }
  0xfc   : > { %371 = vadd.xlane.f32.xlu1 %v366_v30  ;;  %369 = vadd.xlane.f32.xlu0 %v365_v31 }
 0x100   : > { %373 = vadd.xlane.f32.xlu1 %v367_v34  ;;  %312 = vadd.xlane.f32.xlu0 %v306_v35 }
 0x104   : > { %375 = vadd.xlane.f32.xlu1 %v368_v38  ;;  %314 = vadd.xlane.f32.xlu0 %v307_v39 }
 0x115   : > { %334 = vperm.xlu1 %664, %v282_v42  }
 0x119   : > { %665 = vset.pattern.permute.xlu1 %v843_v43 }
 0x185   : > { %v311_v44 = vpop.xlane.xlu1 %310  ;;  %v309_v45 = vpop.xlane.xlu0 %308 }
 0x186   : > { %v316_v50 = vadd.f32 %v311_v44, %v309_v45 }
 0x189   : > { %v372_v46 = vpop.xlane.xlu1 %371  ;;  %v370_v47 = vpop.xlane.xlu0 %369 }
 0x18a   : > { %v377_v51 = vadd.f32 %v372_v46, %v370_v47 }
 0x18d   : > { %v374_v48 = vpop.xlane.xlu1 %373  ;;  %v313_v49 = vpop.xlane.xlu0 %312 }
 0x18e   : > { %v378_v52 = vadd.f32 %v377_v51, %v374_v48  ;;  %v317_v53 = vadd.f32 %v316_v50, %v313_v49 }
 0x191   : > { %v376_v54 = vpop.xlane.xlu1 %375  ;;  %v315_v55 = vpop.xlane.xlu0 %314 }
 0x192   : > { %v379_v56 = vadd.f32 %v378_v52, %v376_v54  ;;  %v318_v57 = vadd.f32 %v317_v53, %v315_v55 }
 0x194   : > { %v380_v58 = vmul.f32 0.001953125, %v379_v56  ;;  %v319_v59 = vmul.f32 0.001953125, %v318_v57 }
 0x195   : > { %v335_v3 = vpop.permute.xlu1 %334 }
 0x196   : > { %v381_v60 = vadd.f32 1e-05, %v380_v58  ;;  %v320_v61 = vadd.f32 1e-05, %v319_v59 }
 0x198   : > { %668 = vrsqrt.f32 %v381_v60 }
 0x199   : > { %670 = vrsqrt.f32 %v320_v61 }
 0x1a2   : > { %v669_v62 = vpop.eup %668 }
 0x1a3   : > { %v671_v63 = vpop.eup %670  ;;  %v383_v0 = vmul.f32 %v669_v62, %v282_v42 }
 0x1a4   : > { %v322_v1 = vmul.f32 %v671_v63, %v282_v42 }
 0x1a5   : > { %386 = vperm.xlu1 %665, %v383_v0  }
 0x1a6   : > { %325 = vperm.xlu0 %663, %v322_v1  }
 0x1a9   : > { %666 = vset.pattern.permute.xlu1 %v844_v2 }
 0x1aa   : > { %394 = vperm.xlu1 %666, %v282_v42   ;;  %667 = vset.pattern.permute.xlu0 %v844_v2 }
 0x224   : > { %v387_v4 = vpop.permute.xlu1 %386 }
 0x225   : > { %v326_v5 = vpop.permute.xlu0 %325  ;;  %v389_v10 = vmul.f32 %v387_v4, %v1064_v29  ;;  %v390_v11 = vmul.f32 %v387_v4, %v1062_v28  ;;  %v391_v12 = vmul.f32 %v387_v4, %v1070_v32  ;;  %v392_v13 = vmul.f32 %v387_v4, %v1078_v36 }
 0x226   : > { %v328_v6 = vmul.f32 %v326_v5, %v1056_v25  ;;  %v329_v7 = vmul.f32 %v326_v5, %v1054_v24  ;;  %v330_v8 = vmul.f32 %v326_v5, %v1072_v33  ;;  %v331_v9 = vmul.f32 %v326_v5, %v303_v37 }
 0x228   : > { %v337_v14 = vadd.f32 %v335_v3, %v328_v6  ;;  %v338_v15 = vadd.f32 %v335_v3, %v329_v7  ;;  %v339_v16 = vadd.f32 %v335_v3, %v330_v8  ;;  %v340_v17 = vadd.f32 %v335_v3, %v331_v9 }
 0x229   : > { %v395_v18 = vpop.permute.xlu1 %394 }
 0x22a   : > { %341 = vst [vmem:[%s270_s8] sm:$0xff] %v337_v14  ;;  %342 = vst [vmem:[%s270_s8 + $0x8] sm:$0xff] %v338_v15  ;;  %v397_v19 = vadd.f32 %v395_v18, %v389_v10  ;;  %v398_v20 = vadd.f32 %v395_v18, %v390_v11  ;;  %v399_v21 = vadd.f32 %v395_v18, %v391_v12 }
 0x22b   : > { %343 = vst [vmem:[%s270_s8 + $0x10] sm:$0xff] %v339_v16  ;;  %344 = vst [vmem:[%s270_s8 + $0x18] sm:$0xff] %v340_v17  ;;  %v400_v22 = vadd.f32 %v395_v18, %v392_v13 }
 0x22c   : > { %745 = shalt.err (!%p742_p0)
}
 0x22d   : > { %s746_s14 = scalar_lea.hbm %s1105_s23, 512  ;;  %s750_s19 = scalar_lea.hbm %s1193_s3, 1024 }
 0x22e   : > { %p747_p4 = scmp.ne.s32.totalorder %s1105_s23, %s746_s14  ;;  %p751_p5 = scmp.lt.u32.totalorder %s1105_s23, %s1193_s3 }
 0x22f   : > { %p752_p6 = scmp.lt.u32.totalorder %s750_s19, %s746_s14  ;;  %p754_p2 = scmp.lt.u32.totalorder %s746_s14, %s1105_s23 }
 0x230   : > { %p748_p1 = pnand %p747_p4, %p1207_p12 }
 0x231   : > { %p753_p13 = por %p752_p6, %p751_p5 }
 0x232   : > { %p749_p3 = pneg %p748_p1 }
 0x233   : > { %p755_p10 = por %p754_p2, %p753_p13 }
 0x235   : > { %p756_p7 = pnand %p755_p10, %p749_p3 }
 0x237   : > { %759 = shalt.err (!%p756_p7)
}
 0x238   : > { %s846_s25 = smov 128   ;;  %s847_s26 = smov 256   ;;  %401 = vst [vmem:[%s1095_s30] sm:$0xff] %v397_v19  ;;  %402 = vst [vmem:[%s1095_s30 + $0x8] sm:$0xff] %v398_v20 }
 0x239   : > { %s848_s22 = smov 8   ;;  %403 = vst [vmem:[%s1095_s30 + $0x10] sm:$0xff] %v399_v21  ;;  %404 = vst [vmem:[%s1095_s30 + $0x18] sm:$0xff] %v400_v22  ;;  %s411_s6 = scalar_lea.sflag [#allocation9], %s1037_s12 }
 0x23a   : > { %601 = dma.vmem_to_hbm [thread:$0]  (%p1207_p12), %s1088_s5, 512, %s1105_s23, %s406_s20, %s846_s25, %s847_s26, %s848_s22  }
 0x23b   : > { %s760_s7 = scalar_lea.vmem %s1107_s13, 512  ;;  %s849_s14 = smov [#allocation8]  }
 0x23c   : > { %p761_p8 = scmp.ne.s32.totalorder %s1107_s13, %s760_s7  ;;  %s764_s8 = sshll.u32 %s849_s14, 4  ;;  %s765_s8 = int_to_ptr.vmem [resolvable:$false] %s764_s8 }
 0x23d   : > { %s766_s9 = scalar_lea.vmem %s765_s8, 1024  ;;  %p767_p0 = scmp.lt.s32.totalorder %s1107_s13, %s765_s8 }
 0x23e   : > { %p762_p9 = pnand %p761_p8, %p1207_p12  ;;  %p768_p4 = scmp.lt.s32.totalorder %s766_s9, %s760_s7 }
 0x240   : > { %p763_p11 = pneg %p762_p9  ;;  %p769_p1 = por %p768_p4, %p767_p0 }
 0x242   : > { %p770_p3 = pnand %p769_p1, %p763_p11 }
 0x244   : > { %773 = shalt.err (!%p770_p3)
}
 0x245   : > { %s774_s5 = scalar_lea.hbm %s1112_s29, 512  ;;  %s778_s20 = scalar_lea.hbm %s1194_s4, 1024 }
 0x246   : > { %p775_p5 = scmp.ne.s32.totalorder %s1112_s29, %s774_s5  ;;  %p779_p2 = scmp.lt.u32.totalorder %s1112_s29, %s1194_s4 }
 0x247   : > { %p780_p10 = scmp.lt.u32.totalorder %s778_s20, %s774_s5  ;;  %p782_p8 = scmp.lt.u32.totalorder %s774_s5, %s1112_s29 }
 0x248   : > { %p776_p6 = pnand %p775_p5, %p1207_p12 }
 0x249   : > { %p781_p7 = por %p780_p10, %p779_p2 }
 0x24a   : > { %p777_p13 = pneg %p776_p6 }
 0x24b   : > { %p783_p9 = por %p782_p8, %p781_p7 }
 0x24d   : > { %p784_p11 = pnand %p783_p9, %p777_p13 }
 0x24f   : > { %787 = shalt.err (!%p784_p11)
}
 0x250   : > { %602 = dma.vmem_to_hbm [thread:$0]  (%p1207_p12), %s1107_s13, 512, %s1112_s29, %s411_s6, %s846_s25, %s847_s26, %s848_s22  }
 0x251 PF: > { %s453_s11 = sand.u32 1, %s822_s15   ;;  %p1208_p0 = scmp.ne.s32.totalorder %s1201_s28, 0 }
 0x252   : > { %p1209_p4 = scmp.ge.s32.totalorder %s834_s18, 2  ;;  %s454_s7 = scalar_lea.sflag [#allocation4], %s453_s11 }
 0x254   : > { %p613_p1 = pnand %p1209_p4, %p1208_p0 }
 0x256   : > { %813 = dma.done.wait (!%p613_p1), %s454_s7, 512  }
 0x257   : > { %815 = vsyncadd (!%p613_p1), %s454_s7, 4294966784  ;;  %s463_s27 = scalar_lea.sflag [#allocation9], %s453_s11 }
 0x258   : > { %817 = dma.done.wait (!%p613_p1), %s463_s27, 512  }
 0x259   : > { %819 = vsyncadd (!%p613_p1), %s463_s27, 4294966784  ;;  %p24_p12 = scmp.ge.s32.totalorder %s900_s21, 4   ;;  %s1210_s15 = smov %s826_s16 }
 0x25a   : > { %s1211_s16 = smov %s830_s17  ;;  %s1212_s17 = smov %s912_s24 }
 0x25b   : > { %s1213_s18 = smov %s900_s21  ;;  %26 = sbr.rel (!%p24_p12) target bundleno = 9 (0x9), region = 110 }
 0x262   :  { %468 = vsyncpa [#allocation3], 1 }
 0x263   :  { %470 = vsyncpa [#allocation3 + $0x1], 1 }
 0x264   :  { %471 = vsyncpa [#allocation6], 1 }
 0x265   :  { %473 = vsyncpa [#allocation6 + $0x1], 1 }
 0x266   :  { %474 = vsyncpa [#allocation4], 1 }
 0x267   :  { %476 = vsyncpa [#allocation4 + $0x1], 1 }
 0x268   :  { %477 = vsyncpa [#allocation9], 1 }
 0x269   :  { %479 = vsyncpa [#allocation9 + $0x1], 1 }

</bundles_post_ra>
